<compile_context>
chip_gen: v6e
topology: v6e:2x2x1
jax: 0.10.0
libtpu: 0.0.40
codegen_flags: <defaults>
</compile_context>

<pallas_src>
import functools

import jax
import jax.numpy as jnp
from jax.experimental import pallas as pl
from jax.experimental.pallas import tpu as pltpu

LANE = 128
SUBLANE = 8
NEG_BIG = -1e30  # "minus infinity" for padded vocab columns (f32-safe)


def _round_up(x, m):
    return (x + m - 1) // m * m


def trigram_mlp_kernel(ids_ref, m_ref, b1_ref, w2_ref, b2_ref, out_ref, *,
                       context_size):
    # ids_ref : [TB, context]        int32  pre-offset: ids[:, c] = id_c + c*Vp
    # m_ref   : [context*Vp, Hp]     bf16   folded emb @ W1 table (padded rows 0)
    # b1_ref  : [1, Hp]              f32    (padded cols 0)
    # w2_ref  : [Hp, Vp]             bf16   (padded rows/cols 0)
    # b2_ref  : [1, Vp]              f32    (padded cols -1e30)
    # out_ref : [TB, Vp]             f32    log-probs (padded cols sliced off outside)
    tb = ids_ref.shape[0]
    kdim = m_ref.shape[0]  # context * Vp

    # One one-hot over the stacked [context*Vp] axis: exactly `context` ones
    # per row (id ranges per context position are disjoint by construction).
    col = jax.lax.broadcasted_iota(jnp.int32, (tb, kdim), 1)
    hit = ids_ref[:, 0:1] == col
    for c in range(1, context_size):          # static, tiny loop (context == 2)
        hit = hit | (ids_ref[:, c:c + 1] == col)
    onehot = hit.astype(m_ref.dtype)          # [TB, context*Vp] bf16

    # Layer 1: single K=256 MXU pass (gather + linear1 fused via folded table),
    # f32 accumulate, f32 bias + tanh (no bf16 VPU/EUP path on v5e).
    h = jnp.tanh(jnp.dot(onehot, m_ref[...],
                         preferred_element_type=jnp.float32) + b1_ref[...])

    # Layer 2: bf16 operands, f32 accumulate, f32 bias.
    logits = jnp.dot(h.astype(w2_ref.dtype), w2_ref[...],
                     preferred_element_type=jnp.float32) + b2_ref[...]

    # Numerically stable log_softmax over the padded vocab axis.  Padded
    # logits are -1e30: never win the max and exp() of them underflows to 0.
    mx = jnp.max(logits, axis=-1, keepdims=True)
    z = logits - mx
    lse = jnp.log(jnp.sum(jnp.exp(z), axis=-1, keepdims=True))
    out_ref[...] = z - lse


def trigram_forward(inputs, emb, w1, b1, w2, b2, context_size, embedding_dim,
                    *, block_b=128):
    """inputs: int32 [B, context_size] token ids in [0, V).

    emb: [V, D], w1: [context*D, H], b1: [H]/[1,H], w2: [H, V], b2: [V]/[1,V].
    Returns f32 log-probs [B, V].
    """
    B = inputs.shape[0]
    V, D = emb.shape
    in1 = context_size * embedding_dim
    H = w1.shape[1]
    assert w1.shape[0] == in1 and w2.shape == (H, V)

    b1 = b1.reshape(1, -1).astype(jnp.float32)
    b2 = b2.reshape(1, -1).astype(jnp.float32)

    # Lane-dense padding of the feature dims; sublane-aligned batch tile.
    Hp = _round_up(H, LANE)
    Vp = _round_up(V, LANE)
    TB = min(block_b, _round_up(B, SUBLANE))
    Bp = _round_up(B, TB)

    # Fold embedding + linear1 weight into one stacked table (computed in f32,
    # stored bf16):  M[c*Vp + v, :Hp] = emb[v] @ W1[c*D:(c+1)*D, :].
    emb_f32 = emb.astype(jnp.float32)
    w1_f32 = w1.astype(jnp.float32)
    m_p = jnp.zeros((context_size * Vp, Hp), jnp.float32)
    for c in range(context_size):
        m_c = emb_f32 @ w1_f32[c * D:(c + 1) * D, :]              # [V, H] f32
        m_p = m_p.at[c * Vp:c * Vp + V, :H].set(m_c)
    m_p = m_p.astype(jnp.bfloat16)

    b1_p = jnp.zeros((1, Hp), jnp.float32).at[:, :H].set(b1)
    w2_p = jnp.zeros((Hp, Vp), jnp.bfloat16).at[:H, :V].set(w2.astype(jnp.bfloat16))
    # Padded vocab columns get a huge negative bias so log_softmax ignores them.
    b2_p = jnp.full((1, Vp), NEG_BIG, jnp.float32).at[:, :V].set(b2)

    # Pre-offset ids per context position so the kernel needs one iota only.
    offs = (jnp.arange(context_size, dtype=jnp.int32) * Vp)[None, :]
    ids_p = jnp.zeros((Bp, context_size), jnp.int32).at[:B, :].set(
        inputs.astype(jnp.int32) + offs)
    # Padded batch rows keep id 0 (+ offsets): valid rows, sliced off below.

    kernel = functools.partial(trigram_mlp_kernel, context_size=context_size)

    cost = pl.CostEstimate(
        flops=2 * Bp * (context_size * Vp * Hp + Hp * Vp),
        transcendentals=Bp * (Hp + Vp + 1),      # tanh + exp + log
        bytes_accessed=(ids_p.size * 4 + m_p.size * 2 + b1_p.size * 4
                        + w2_p.size * 2 + b2_p.size * 4 + Bp * Vp * 4),
    )

    out_p = pl.pallas_call(
        kernel,
        out_shape=jax.ShapeDtypeStruct((Bp, Vp), jnp.float32),
        grid_spec=pltpu.PrefetchScalarGridSpec(
            num_scalar_prefetch=0,
            grid=(Bp // TB,),
            in_specs=[
                pl.BlockSpec((TB, context_size), lambda i: (i, 0)),     # ids (per block)
                pl.BlockSpec((context_size * Vp, Hp), lambda i: (0, 0)),  # folded table
                pl.BlockSpec((1, Hp), lambda i: (0, 0)),                # b1
                pl.BlockSpec((Hp, Vp), lambda i: (0, 0)),               # w2
                pl.BlockSpec((1, Vp), lambda i: (0, 0)),                # b2
            ],
            out_specs=pl.BlockSpec((TB, Vp), lambda i: (i, 0)),
        ),
        compiler_params=pltpu.CompilerParams(
            dimension_semantics=("parallel",),  # batch blocks are independent
        ),
        cost_estimate=cost,
    )(ids_p, m_p, b1_p, w2_p, b2_p)

    # Strip batch / vocab padding.
    return out_p[:B, :V]

    # TODO(synk): for a realistic vocabulary (tens of thousands), add a second
    # grid axis tiling w2/b2/out over V with an online (flash-style) log-softmax
    # accumulator (mark it "arbitrary"), and replace the one-hot gather with a
    # DMA / scalar-prefetch gather -- required on v7x whose 64 MiB VMEM cannot
    # hold a resident [Hp, Vp] w2 plus a double-buffered [TB, Vp] f32 output.


if __name__ == "__main__":
    # Small shapes consistent with the module's forward; batch large enough to
    # feed the 128-wide padded tiles and give the grid 2 parallel steps.
    vocab_size = 64
    embedding_dim = 16
    context_size = 2     # trigram model: 2 context words
    h = 32
    batch = 256

    key = jax.random.PRNGKey(0)
    k_emb, k_w1, k_b1, k_w2, k_b2, k_in = jax.random.split(key, 6)

    emb = jax.random.normal(k_emb, (vocab_size, embedding_dim), jnp.float32)
    in1 = context_size * embedding_dim
    w1 = jax.random.uniform(k_w1, (in1, h), jnp.float32,
                            minval=-1.0 / jnp.sqrt(in1), maxval=1.0 / jnp.sqrt(in1))
    b1 = jax.random.uniform(k_b1, (1, h), jnp.float32,
                            minval=-1.0 / jnp.sqrt(in1), maxval=1.0 / jnp.sqrt(in1))
    w2 = jax.random.uniform(k_w2, (h, vocab_size), jnp.float32,
                            minval=-1.0 / jnp.sqrt(h), maxval=1.0 / jnp.sqrt(h))
    b2 = jax.random.uniform(k_b2, (1, vocab_size), jnp.float32,
                            minval=-1.0 / jnp.sqrt(h), maxval=1.0 / jnp.sqrt(h))

    inputs = jax.random.randint(k_in, (batch, context_size), 0, vocab_size, jnp.int32)

    log_probs = trigram_forward(inputs, emb, w1, b1, w2, b2,
                                context_size, embedding_dim)
    log_probs = jax.block_until_ready(log_probs)
    assert log_probs.shape == (batch, vocab_size)

    # Reference 1: full f32 forward (module semantics); loose tol for the bf16
    # folded table / bf16 second-layer operands.
    x_f32 = jnp.take(emb, inputs, axis=0).reshape(batch, in1)
    logits_f32 = jnp.tanh(x_f32 @ w1 + b1) @ w2 + b2
    ref_f32 = jax.nn.log_softmax(logits_f32, axis=1)
    assert jnp.allclose(log_probs, ref_f32, atol=5e-2), "mismatch vs f32 reference"

    # Reference 2: emulate the kernel's arithmetic exactly (folded bf16 table,
    # f32 row-sum, f32 bias/tanh, bf16 h, bf16 w2, f32 log_softmax).
    Vp = _round_up(vocab_size, LANE)
    m_ref_tbl = jnp.zeros((context_size * Vp, _round_up(h, LANE)), jnp.float32)
    for c in range(context_size):
        m_c = emb @ w1[c * embedding_dim:(c + 1) * embedding_dim, :]
        m_ref_tbl = m_ref_tbl.at[c * Vp:c * Vp + vocab_size, :h].set(m_c)
    m_ref_tbl = m_ref_tbl.astype(jnp.bfloat16)
    ids_off = inputs + (jnp.arange(context_size, dtype=jnp.int32) * Vp)[None, :]
    rows = jnp.take(m_ref_tbl, ids_off, axis=0).astype(jnp.float32)   # [B, C, Hp]
    acc = jnp.sum(rows, axis=1)[:, :h]
    h_bf = jnp.tanh(acc + b1).astype(jnp.bfloat16)
    logits_bf = jnp.dot(h_bf, w2.astype(jnp.bfloat16),
                        preferred_element_type=jnp.float32) + b2
    ref_bf = jax.nn.log_softmax(logits_bf, axis=1)
    assert jnp.allclose(log_probs, ref_bf, atol=2e-3), "mismatch vs bf16-emulated reference"

    print("KERNEL_OK")
</pallas_src>

<mosaic_0001>
module attributes {stable_mosaic.version = 11 : i64} {
  func.func @trigram_mlp_kernel(%arg0: i32, %arg1: memref<128x2xi32, #tpu.memory_space<vmem>>, %arg2: memref<256x128xbf16, #tpu.memory_space<vmem>>, %arg3: memref<1x128xf32, #tpu.memory_space<vmem>>, %arg4: memref<128x128xbf16, #tpu.memory_space<vmem>>, %arg5: memref<1x128xf32, #tpu.memory_space<vmem>>, %arg6: memref<128x128xf32, #tpu.memory_space<vmem>>) attributes {dimension_semantics = [#tpu.dimension_semantics<parallel>], iteration_bounds = array<i64: 2>, scalar_prefetch = 0 : i64, scratch_operands = 0 : i64, tpu.core_type = #tpu.core_type<tc>, window_params = [{transform_indices = @transform_0, window_bounds = array<i64: 128, 2>}, {pipeline_mode = #tpu.pipeline_mode<synchronous>, transform_indices = @transform_1, window_bounds = array<i64: 256, 128>}, {pipeline_mode = #tpu.pipeline_mode<synchronous>, transform_indices = @transform_2, window_bounds = array<i64: 1, 128>}, {pipeline_mode = #tpu.pipeline_mode<synchronous>, transform_indices = @transform_3, window_bounds = array<i64: 128, 128>}, {pipeline_mode = #tpu.pipeline_mode<synchronous>, transform_indices = @transform_4, window_bounds = array<i64: 1, 128>}, {transform_indices = @transform_5, window_bounds = array<i64: 128, 128>}]} {
    %0 = tpu.iota {dimensions = array<i32: 1>} : vector<128x256xi32>
    %c0 = arith.constant 0 : index
    %c0_0 = arith.constant 0 : index
    %1 = vector.load %arg1[%c0, %c0_0] : memref<128x2xi32, #tpu.memory_space<vmem>>, vector<128x1xi32>
    %2 = vector.broadcast %1 : vector<128x1xi32> to vector<128x256xi32>
    %3 = arith.cmpi eq, %2, %0 : vector<128x256xi32>
    %c0_1 = arith.constant 0 : index
    %c1 = arith.constant 1 : index
    %4 = vector.load %arg1[%c0_1, %c1] : memref<128x2xi32, #tpu.memory_space<vmem>>, vector<128x1xi32>
    %5 = vector.broadcast %4 : vector<128x1xi32> to vector<128x256xi32>
    %6 = arith.cmpi eq, %5, %0 : vector<128x256xi32>
    %7 = arith.ori %3, %6 : vector<128x256xi1>
    %8 = arith.extui %7 : vector<128x256xi1> to vector<128x256xi32>
    %9 = arith.sitofp %8 : vector<128x256xi32> to vector<128x256xf32>
    %10 = arith.truncf %9 : vector<128x256xf32> to vector<128x256xbf16>
    %c0_2 = arith.constant 0 : index
    %c0_3 = arith.constant 0 : index
    %11 = vector.load %arg2[%c0_2, %c0_3] : memref<256x128xbf16, #tpu.memory_space<vmem>>, vector<256x128xbf16>
    %cst = arith.constant dense<0.000000e+00> : vector<128x128xf32>
    %12 = tpu.matmul %10, %11, %cst {dimension_numbers = #tpu.dot_dimension_numbers<[1], [0], [0], [1], [0, 0, 1, 1], [], []>} : vector<128x256xbf16>, vector<256x128xbf16>, vector<128x128xf32> -> vector<128x128xf32>
    %c0_4 = arith.constant 0 : index
    %c0_5 = arith.constant 0 : index
    %13 = vector.load %arg3[%c0_4, %c0_5] : memref<1x128xf32, #tpu.memory_space<vmem>>, vector<1x128xf32>
    %14 = vector.broadcast %13 : vector<1x128xf32> to vector<128x128xf32>
    %15 = arith.addf %12, %14 : vector<128x128xf32>
    %16 = math.tanh %15 : vector<128x128xf32>
    %17 = arith.truncf %16 : vector<128x128xf32> to vector<128x128xbf16>
    %c0_6 = arith.constant 0 : index
    %c0_7 = arith.constant 0 : index
    %18 = vector.load %arg4[%c0_6, %c0_7] : memref<128x128xbf16, #tpu.memory_space<vmem>>, vector<128x128xbf16>
    %cst_8 = arith.constant dense<0.000000e+00> : vector<128x128xf32>
    %19 = tpu.matmul %17, %18, %cst_8 {dimension_numbers = #tpu.dot_dimension_numbers<[1], [0], [0], [1], [0, 0, 1, 1], [], []>} : vector<128x128xbf16>, vector<128x128xbf16>, vector<128x128xf32> -> vector<128x128xf32>
    %c0_9 = arith.constant 0 : index
    %c0_10 = arith.constant 0 : index
    %20 = vector.load %arg5[%c0_9, %c0_10] : memref<1x128xf32, #tpu.memory_space<vmem>>, vector<1x128xf32>
    %21 = vector.broadcast %20 : vector<1x128xf32> to vector<128x128xf32>
    %22 = arith.addf %19, %21 : vector<128x128xf32>
    %cst_11 = arith.constant dense<0xFF800000> : vector<128xf32>
    %23 = vector.multi_reduction <maximumf>, %22, %cst_11 [1] : vector<128x128xf32> to vector<128xf32>
    %24 = vector.shape_cast %23 : vector<128xf32> to vector<128x1xf32>
    %25 = vector.broadcast %24 : vector<128x1xf32> to vector<128x128xf32>
    %26 = arith.subf %22, %25 : vector<128x128xf32>
    %27 = math.exp %26 : vector<128x128xf32>
    %cst_12 = arith.constant dense<0.000000e+00> : vector<128xf32>
    %28 = vector.multi_reduction <add>, %27, %cst_12 [1] : vector<128x128xf32> to vector<128xf32>
    %29 = vector.shape_cast %28 : vector<128xf32> to vector<128x1xf32>
    %30 = math.log %29 : vector<128x1xf32>
    %31 = vector.broadcast %30 : vector<128x1xf32> to vector<128x128xf32>
    %32 = arith.subf %26, %31 : vector<128x128xf32>
    %c0_13 = arith.constant 0 : index
    %c0_14 = arith.constant 0 : index
    %33 = vector.load %arg6[%c0_13, %c0_14] : memref<128x128xf32, #tpu.memory_space<vmem>>, vector<128x128xf32>
    tpu.vector_store %arg6[%c0_13, %c0_14], %32 {strides = array<i32>} : memref<128x128xf32, #tpu.memory_space<vmem>>, vector<128x128xf32>,
    return
  }
  func.func @transform_0(%arg0: i32) -> (i32, i32) {
    %c0_i32 = arith.constant 0 : i32
    %c0_i32_0 = arith.constant 0 : i32
    return %arg0, %c0_i32 : i32, i32
  }
  func.func @transform_1(%arg0: i32) -> (i32, i32) {
    %c0_i32 = arith.constant 0 : i32
    %c0_i32_0 = arith.constant 0 : i32
    %c0_i32_1 = arith.constant 0 : i32
    return %c0_i32, %c0_i32_0 : i32, i32
  }
  func.func @transform_2(%arg0: i32) -> (i32, i32) {
    %c0_i32 = arith.constant 0 : i32
    %c0_i32_0 = arith.constant 0 : i32
    %c0_i32_1 = arith.constant 0 : i32
    return %c0_i32, %c0_i32_0 : i32, i32
  }
  func.func @transform_3(%arg0: i32) -> (i32, i32) {
    %c0_i32 = arith.constant 0 : i32
    %c0_i32_0 = arith.constant 0 : i32
    %c0_i32_1 = arith.constant 0 : i32
    return %c0_i32, %c0_i32_0 : i32, i32
  }
  func.func @transform_4(%arg0: i32) -> (i32, i32) {
    %c0_i32 = arith.constant 0 : i32
    %c0_i32_0 = arith.constant 0 : i32
    %c0_i32_1 = arith.constant 0 : i32
    return %c0_i32, %c0_i32_0 : i32, i32
  }
  func.func @transform_5(%arg0: i32) -> (i32, i32) {
    %c0_i32 = arith.constant 0 : i32
    %c0_i32_0 = arith.constant 0 : i32
    return %arg0, %c0_i32 : i32, i32
  }
}

</mosaic_0001>

<bundles_post_ra>
// kernel: tpu_custom_call.1
= control target key start
LH: loop header
LB: loop body
LE: loop exit
PB: predicated region body
PF: predicated region fallthrough
CT: control target
= control target key end

     0   :  { %10 = vsyncpa [#allocation3], 0  ;;  %s2150_s0 = inlined_call_operand.vmem [shape: s32[256,2], index: 0, kind: input, shape index: {}]   ;;  %s2151_s1 = inlined_call_operand.vmem [shape: bf16[256,128], index: 1, kind: input, shape index: {}]   ;;  %s2152_s2 = inlined_call_operand.vmem [shape: f32[1,128], index: 2, kind: input, shape index: {}]   ;;  %s2153_s3 = inlined_call_operand.vmem [shape: bf16[128,128], index: 3, kind: input, shape index: {}]   ;;  %s2154_s4 = inlined_call_operand.vmem [shape: f32[1,128], index: 4, kind: input, shape index: {}]   ;;  %s2155_s5 = inlined_call_operand.hbm [shape: f32[256,128], index: 5, kind: output, shape index: {}]  }
   0x1   :  { %12 = vsyncpa [#allocation3 + $0x1], 0  ;;  %s1692_s18 = smov 0   ;;  %s1694_s19 = smov 0  }
   0x2   :  { %s1696_s20 = smov 0   ;;  %s1698_s21 = smov 0  }
   0x3 LB: > { %s1713_s22 = sadd.s32 4294967295, %s1654_s21   ;;  %s1194_s23 = sadd.s32 4294967294, %s1654_s21   ;;  %s1654_s21 = sphi %s1698_s21, %s2167_s21   ;;  %s1650_s20 = sphi %s1696_s20, %s2166_s20   ;;  %s1646_s19 = sphi %s1694_s19, %s2165_s19   ;;  %s1642_s18 = sphi %s1692_s18, %s2164_s18  }
   0x4   : > { %s1717_s24 = sadd.s32 1, %s1654_s21   ;;  %s135_s25 = sadd.s32 1, %s1650_s20 }
   0x5   : > { %s132_s26 = ssub.s32 %s1654_s21, %s1717_s24  ;;  %p145_p0 = scmp.ne.s32.totalorder %s1650_s20, %s1646_s19 }
   0x6   : > { %p133_p1 = scmp.eq.s32.totalorder %s132_s26, 0  ;;  %p146_p2 = scmp.eq.s32.totalorder %s1713_s22, 1 }
   0x7   : > { %p151_p3 = scmp.ne.s32.totalorder %s1646_s19, %s1642_s18  ;;  %p152_p4 = scmp.eq.s32.totalorder %s1194_s23, 1 }
   0x8   : > { %s1728_s27 = scalar_select %p133_p1, %s1650_s20, %s135_s25  }
   0x9   : > { %p1730_p5 = por %p146_p2, %p145_p0  ;;  %p1734_p6 = por %p152_p4, %p151_p3 }
   0xa   : > { %p1197_p7 = scmp.ge.s32.totalorder %s1654_s21, 1  ;;  %p191_p8 = scmp.lt.s32.totalorder %s1654_s21, 3 }
   0xc   : > { %p192_p9 = pnand %p1197_p7, %p191_p8 }
   0xd   : > { %s1199_s30 = sshll.u32 (!%p192_p9), %s1713_s22, 4  ;;  %s1296_s17 = sshll.u32 (!%p192_p9), %s1713_s22, 11 }
   0xe   : > { %195 = sbr.rel (%p192_p9) target bundleno = 989 (0x3dd), region = 40  ;;  %p220_p10 = scmp.lt.s32.totalorder (!%p192_p9), %s1199_s30, 31 }
   0xf   : > { %s1659_s8 = smov (!%p192_p9), [#allocation2]  }
  0x10   : > { %s1598_s9 = sshll.u32 (!%p192_p9), %s1659_s8, 4  ;;  %s1599_s9 = int_to_ptr.vmem [resolvable:$false] %s1598_s9 }
  0x11   : > { %s1600_s10 = scalar_lea.vmem (!%p192_p9), %s1599_s9, 4096 }
  0x13   : > { %v1474_v0 = vld [vmem:[%s2151_s1 + $0x78] sm:$0xff]   ;;  %v1656_v1 = vmov 1   ;;  %v1657_v2 = vmov 0   ;;  %s2169_s30 = smov (!%p220_p10, %s1199_s30), 31  ;;  %v1476_v4 = vld [vmem:[%s2151_s1 + $0x70] sm:$0xff]   ;;  %v1478_v6 = vld [vmem:[%s2151_s1 + $0x68] sm:$0xff]   ;;  %v227_v34 = vlaneseq }
  0x14   : > { %1454 = vset.pattern.permute.xlu1 %v1656_v1  ;;  %1453 = vset.pattern.permute.xlu0 %v1657_v2  ;;  %v1475_v3 = vld [vmem:[%s2151_s1 + $0x38] sm:$0xff]   ;;  %v1477_v5 = vld [vmem:[%s2151_s1 + $0x30] sm:$0xff]   ;;  %s1200_s14 = sshll.u32 %s2169_s30, 3  ;;  %v1479_v8 = vld [vmem:[%s2151_s1 + $0x28] sm:$0xff]   ;;  %v1658_v43 = vmov 1.0|1.0   ;;  %s2102_s30 = scalar_lea.hbm %s2155_s5, %s1296_s17 }
  0x15   : > { %1297 = vmatprep.subr.bf16.mxu0 %v1474_v0  ;;  %s1761_s25 = scalar_lea.vmem %s2150_s0, %s1200_s14  ;;  %v1480_v12 = vld [vmem:[%s2151_s1 + $0x60] sm:$0xff]   ;;  %v1482_v14 = vld [vmem:[%s2151_s1 + $0x58] sm:$0xff]   ;;  %v1484_v16 = vld [vmem:[%s2151_s1 + $0x50] sm:$0xff]   ;;  %v1831_v35 = vand.u32 127, %v227_v34  ;;  %s216_s14 = sand.u32 1, %s1646_s19  }
  0x16   : > { %1298 = vmatpush3.bf16.msra.mxu0 %v1475_v3  ;;  %v230_v7 = vld [vmem:[%s1761_s25] sm:$0xff]  ;;  %v231_v9 = vld [vmem:[%s1761_s25 + $0x8] sm:$0xff]  ;;  %v233_v10 = vld [vmem:[%s1761_s25 + $0x18] sm:$0xff]  ;;  %s1198_s15 = sshll.u32 %s216_s14, 7  ;;  %s2110_s22 = scalar_lea.sflag [#allocation3], %s216_s14 }
  0x17   : > { %1299 = vmatprep.subr.bf16.mxu0 %v1476_v4  ;;  %327 = vperm.xlu1 %1454, %v230_v7   ;;  %v232_v11 = vld [vmem:[%s1761_s25 + $0x10] sm:$0xff]  ;;  %v1481_v13 = vld [vmem:[%s2151_s1 + $0x20] sm:$0xff]   ;;  %v1483_v15 = vld [vmem:[%s2151_s1 + $0x18] sm:$0xff]   ;;  %v1834_v36 = vadd.s32 128, %v1831_v35  ;;  %s2066_s16 = scalar_lea.vmem [#allocation2], %s1198_s15 }
  0x18   : > { %247 = vperm.xlu0 %1453, %v230_v7   ;;  %v1485_v17 = vld [vmem:[%s2151_s1 + $0x10] sm:$0xff]   ;;  %v1486_v19 = vld [vmem:[%s2151_s1 + $0x48] sm:$0xff]   ;;  %v234_v21 = vld [vmem:[%s1761_s25 + $0x20] sm:$0xff]  ;;  %s1132_s23 = sshll.u32 %s2066_s16, 4  ;;  %s2104_s23 = int_to_ptr.vmem [resolvable:$true] %s1132_s23 }
  0x19   : > { %v236_v18 = vld [vmem:[%s1761_s25 + $0x30] sm:$0xff]  ;;  %v1487_v20 = vld [vmem:[%s2151_s1 + $0x8] sm:$0xff]   ;;  %v1488_v22 = vld [vmem:[%s2151_s1 + $0x40] sm:$0xff]   ;;  %s1594_s7 = scalar_lea.vmem %s2104_s23, 2048  ;;  %p1601_p0 = scmp.lt.s32.totalorder %s2104_s23, %s1599_s9 }
  0x1a   : > { %1300 = vmatpush3.bf16.msra.mxu0 %v1477_v5  ;;  %v235_v23 = vld [vmem:[%s1761_s25 + $0x28] sm:$0xff]  ;;  %v1489_v24 = vld [vmem:[%s2151_s1] sm:$0xff]   ;;  %v237_v26 = vld [vmem:[%s1761_s25 + $0x38] sm:$0xff]  ;;  %p1595_p11 = scmp.ne.s32.totalorder %s2104_s23, %s1594_s7  ;;  %p1602_p1 = scmp.lt.s32.totalorder %s1600_s10, %s1594_s7 }
  0x1b   : > { %1301 = vmatprep.subr.bf16.mxu0 %v1478_v6  ;;  %330 = vperm.xlu1 %1454, %v231_v9   ;;  %v239_v25 = vld [vmem:[%s1761_s25 + $0x48] sm:$0xff]  ;;  %v240_v27 = vld [vmem:[%s1761_s25 + $0x50] sm:$0xff]  ;;  %v238_v28 = vld [vmem:[%s1761_s25 + $0x40] sm:$0xff] }
  0x1c   : > { %250 = vperm.xlu0 %1453, %v231_v9   ;;  %v243_v29 = vld [vmem:[%s1761_s25 + $0x68] sm:$0xff]  ;;  %v244_v30 = vld [vmem:[%s1761_s25 + $0x70] sm:$0xff]  ;;  %v241_v31 = vld [vmem:[%s1761_s25 + $0x58] sm:$0xff]  ;;  %p1596_p12 = pnand %p1595_p11, %p1730_p5  ;;  %p1603_p2 = por %p1602_p1, %p1601_p0 }
  0x1d   : > { %v242_v32 = vld [vmem:[%s1761_s25 + $0x60] sm:$0xff]  ;;  %v245_v33 = vld [vmem:[%s1761_s25 + $0x78] sm:$0xff] }
  0x1e   : > { %1302 = vmatpush3.bf16.msra.mxu0 %v1479_v8  ;;  %v1490_v5 = vld [vmem:[%s2153_s3 + $0x38] sm:$0xff]   ;;  %v1491_v8 = vld [vmem:[%s2153_s3 + $0x30] sm:$0xff]   ;;  %p1597_p13 = pneg %p1596_p12 }
  0x1f   : > { %1303 = vmatprep.subr.bf16.mxu0 %v1480_v12  ;;  %1455 = vset.pattern.permute.xlu1 %v1657_v2  ;;  %v1493_v12 = vld [vmem:[%s2153_s3 + $0x20] sm:$0xff]  }
  0x20   : > { %253 = vperm.xlu0 %1453, %v232_v11   ;;  %256 = vperm.xlu1 %1455, %v233_v10   ;;  %p1604_p3 = pnand %p1603_p2, %p1597_p13 }
  0x21   : > { %1377 = vmatprep.subr.bf16.mxu1 %v1490_v5 }
  0x22   : > { %1304 = vmatpush3.bf16.msra.mxu0 %v1481_v13  ;;  %1378 = vmatpush3.bf16.msra.mxu1 %v1490_v5  ;;  %v1494_v13 = vld [vmem:[%s2153_s3 + $0x18] sm:$0xff]  }
  0x23   : > { %1305 = vmatprep.subr.bf16.mxu0 %v1482_v14  ;;  %1379 = vmatprep.subr.bf16.mxu1 %v1491_v8  ;;  %v1495_v14 = vld [vmem:[%s2153_s3 + $0x10] sm:$0xff]  }
  0x24   : > { %1456 = vset.pattern.permute.xlu0 %v1656_v1  ;;  %1457 = vset.pattern.permute.xlu1 %v1656_v1 }
  0x25   : > { %333 = vperm.xlu0 %1456, %v232_v11   ;;  %336 = vperm.xlu1 %1457, %v233_v10   ;;  %v1492_v11 = vld [vmem:[%s2153_s3 + $0x28] sm:$0xff]  }
  0x26   : > { %1306 = vmatpush3.bf16.msra.mxu0 %v1483_v15  ;;  %1380 = vmatpush3.bf16.msra.mxu1 %v1491_v8  ;;  %v1496_v15 = vld [vmem:[%s2153_s3 + $0x8] sm:$0xff]  }
  0x27   : > { %1307 = vmatprep.subr.bf16.mxu0 %v1484_v16  ;;  %1381 = vmatprep.subr.bf16.mxu1 %v1492_v11  ;;  %v1497_v16 = vld [vmem:[%s2153_s3] sm:$0xff]  }
  0x29   : > { %345 = vperm.xlu0 %1456, %v236_v18   ;;  %1458 = vset.pattern.permute.xlu1 %v1657_v2 }
  0x2a   : > { %1308 = vmatpush3.bf16.msra.mxu0 %v1485_v17  ;;  %259 = vperm.xlu1 %1458, %v234_v21  }
  0x2b   : > { %1309 = vmatprep.subr.bf16.mxu0 %v1486_v19  ;;  %1382 = vmatpush3.bf16.msra.mxu1 %v1492_v11  ;;  %v1961_v19 = vld [vmem:[%s2152_s2] ss:$0 sm:$0xff] }
  0x2c   : > { %1383 = vmatprep.subr.bf16.mxu1 %v1493_v12 }
  0x2d   : > { %1461 = vset.pattern.permute.xlu0 %v1657_v2 }
  0x2e   : > { %1310 = vmatpush3.bf16.msra.mxu0 %v1487_v20  ;;  %262 = vperm.xlu0 %1461, %v235_v23  }
  0x2f   : > { %1311 = vmatprep.subr.bf16.mxu0 %v1488_v22  ;;  %1459 = vset.pattern.permute.xlu1 %v1656_v1 }
  0x30   : > { %339 = vperm.xlu1 %1459, %v234_v21   ;;  %1384 = vmatpush3.bf16.msra.mxu1 %v1493_v12 }
  0x31   : > { %1385 = vmatprep.subr.bf16.mxu1 %v1494_v13 }
  0x32   : > { %1312 = vmatpush3.bf16.msra.mxu0 %v1489_v24  ;;  %265 = vperm.xlu0 %1461, %v236_v18  }
  0x34   : > { %342 = vperm.xlu1 %1459, %v235_v23   ;;  %1386 = vmatpush3.bf16.msra.mxu1 %v1494_v13 }
  0x35   : > { %1387 = vmatprep.subr.bf16.mxu1 %v1495_v14 }
  0x36   : > { %274 = vperm.xlu0 %1461, %v239_v25  }
  0x38   : > { %1460 = vset.pattern.permute.xlu1 %v1657_v2  ;;  %1388 = vmatpush3.bf16.msra.mxu1 %v1495_v14 }
  0x39   : > { %268 = vperm.xlu1 %1460, %v237_v26   ;;  %1389 = vmatprep.subr.bf16.mxu1 %v1496_v15 }
  0x3a   : > { %1466 = vset.pattern.permute.xlu0 %v1656_v1 }
  0x3b   : > { %357 = vperm.xlu0 %1466, %v240_v27  }
  0x3c   : > { %1390 = vmatpush3.bf16.msra.mxu1 %v1496_v15 }
  0x3d   : > { %1462 = vset.pattern.permute.xlu1 %v1656_v1  ;;  %1391 = vmatprep.subr.bf16.mxu1 %v1497_v16 }
  0x3e   : > { %348 = vperm.xlu1 %1462, %v237_v26  }
  0x3f   : > { %1467 = vset.pattern.permute.xlu0 %v1657_v2 }
  0x40   : > { %277 = vperm.xlu0 %1467, %v240_v27   ;;  %1392 = vmatpush3.bf16.msra.mxu1 %v1497_v16 }
  0x42   : > { %1463 = vset.pattern.permute.xlu1 %v1657_v2 }
  0x43   : > { %271 = vperm.xlu1 %1463, %v238_v28  }
  0x44   : > { %286 = vperm.xlu0 %1467, %v243_v29  }
  0x47   : > { %1464 = vset.pattern.permute.xlu1 %v1656_v1 }
  0x48   : > { %351 = vperm.xlu1 %1464, %v238_v28   ;;  %289 = vperm.xlu0 %1467, %v244_v30  }
  0x4c   : > { %354 = vperm.xlu1 %1464, %v239_v25   ;;  %1472 = vset.pattern.permute.xlu0 %v1656_v1 }
  0x4d   : > { %369 = vperm.xlu0 %1472, %v244_v30  }
  0x50   : > { %1465 = vset.pattern.permute.xlu1 %v1657_v2 }
  0x51   : > { %280 = vperm.xlu1 %1465, %v241_v31  }
  0x55   : > { %1468 = vset.pattern.permute.xlu1 %v1656_v1 }
  0x56   : > { %360 = vperm.xlu1 %1468, %v241_v31  }
  0x5a   : > { %1469 = vset.pattern.permute.xlu1 %v1657_v2 }
  0x5b   : > { %283 = vperm.xlu1 %1469, %v242_v32  }
  0x5f   : > { %1470 = vset.pattern.permute.xlu1 %v1656_v1 }
  0x60   : > { %363 = vperm.xlu1 %1470, %v242_v32  }
  0x64   : > { %366 = vperm.xlu1 %1470, %v243_v29  }
  0x68   : > { %1471 = vset.pattern.permute.xlu1 %v1657_v2 }
  0x69   : > { %292 = vperm.xlu1 %1471, %v245_v33  }
  0x6d   : > { %1473 = vset.pattern.permute.xlu1 %v1656_v1 }
  0x6e   : > { %372 = vperm.xlu1 %1473, %v245_v33  }
  0x92   : > { %v328_v37 = vpop.permute.xlu1 %327 }
  0x93   : > { %v248_v38 = vpop.permute.xlu0 %247  ;;  %vm374_vm0 = vcmp.eq.s32.totalorder %v328_v37, %v1831_v35  ;;  %vm375_vm2 = vcmp.eq.s32.totalorder %v328_v37, %v1834_v36 }
  0x94   : > { %vm294_vm1 = vcmp.eq.s32.totalorder %v248_v38, %v1831_v35  ;;  %vm295_vm3 = vcmp.eq.s32.totalorder %v248_v38, %v1834_v36 }
  0x95   : > { %vm1840_vm4 = vmor %vm294_vm1, %vm374_vm0 }
  0x96   : > { %v331_v40 = vpop.permute.xlu1 %330  ;;  %vm407_vm9 = vmor %vm295_vm3, %vm375_vm2 }
  0x97   : > { %v251_v41 = vpop.permute.xlu0 %250  ;;  %vm376_vm5 = vcmp.eq.s32.totalorder %v331_v40, %v1831_v35  ;;  %vm377_vm6 = vcmp.eq.s32.totalorder %v331_v40, %v1834_v36 }
  0x98   : > { %vm296_vm7 = vcmp.eq.s32.totalorder %v251_v41, %v1831_v35  ;;  %vm297_vm8 = vcmp.eq.s32.totalorder %v251_v41, %v1834_v36 }
  0x99   : > { %vm408_vm10 = vmor %vm296_vm7, %vm376_vm5 }
  0x9a   : > { %vm409_vm11 = vmor %vm297_vm8, %vm377_vm6 }
  0x9b   : > { %vm1250_vm12 = vmpackc.low %vm409_vm11, %vm407_vm9  ;;  %v254_v42 = vpop.permute.xlu0 %253  ;;  %v257_v44 = vpop.permute.xlu1 %256 }
  0x9c   : > { %1251 = vmatprep.mubr.msk.bf16.mxu0 %vm1250_vm12, %v1658_v43  ;;  %vm1252_vm13 = vmpackc.low %vm408_vm10, %vm1840_vm4  ;;  %vm298_vm14 = vcmp.eq.s32.totalorder %v254_v42, %v1831_v35  ;;  %vm299_vm15 = vcmp.eq.s32.totalorder %v254_v42, %v1834_v36  ;;  %vm300_vm1 = vcmp.eq.s32.totalorder %v257_v44, %v1831_v35  ;;  %vm301_vm4 = vcmp.eq.s32.totalorder %v257_v44, %v1834_v36 }
  0x9d   : > { %1253 = vmatmul.mubr.msk.bf16.vlgmr.msra.gmra.mxu0 %vm1252_vm13, %v1658_v43 }
  0xa0   : > { %v334_v45 = vpop.permute.xlu0 %333  ;;  %v337_v46 = vpop.permute.xlu1 %336 }
  0xa1   : > { %vm378_vm0 = vcmp.eq.s32.totalorder %v334_v45, %v1831_v35  ;;  %vm380_vm2 = vcmp.eq.s32.totalorder %v337_v46, %v1831_v35  ;;  %vm381_vm3 = vcmp.eq.s32.totalorder %v337_v46, %v1834_v36  ;;  %vm379_vm5 = vcmp.eq.s32.totalorder %v334_v45, %v1834_v36 }
  0xa2   : > { %vm410_vm6 = vmor %vm298_vm14, %vm378_vm0 }
  0xa3   : > { %vm412_vm7 = vmor %vm300_vm1, %vm380_vm2 }
  0xa4   : > { %vm413_vm8 = vmor %vm301_vm4, %vm381_vm3  ;;  %v346_v47 = vpop.permute.xlu0 %345 }
  0xa5   : > { %vm411_vm9 = vmor %vm299_vm15, %vm379_vm5  ;;  %v260_v48 = vpop.permute.xlu1 %259 }
  0xa6   : > { %vm1254_vm10 = vmpackc.low %vm413_vm8, %vm411_vm9  ;;  %vm302_vm14 = vcmp.eq.s32.totalorder %v260_v48, %v1831_v35  ;;  %vm303_vm15 = vcmp.eq.s32.totalorder %v260_v48, %v1834_v36 }
  0xa7   : > { %1255 = vmatprep.mubr.msk.bf16.mxu0 %vm1254_vm10, %v1658_v43  ;;  %vm1256_vm11 = vmpackc.low %vm412_vm7, %vm410_vm6  ;;  %vm386_vm10 = vcmp.eq.s32.totalorder %v346_v47, %v1831_v35 }
  0xa8   : > { %1257 = vmatmul.mubr.msk.bf16.gmra.mxu0 %vm1256_vm11, %v1658_v43 }
  0xa9   : > { %v263_v50 = vpop.permute.xlu0 %262 }
  0xaa   : > { %vm304_vm0 = vcmp.eq.s32.totalorder %v263_v50, %v1831_v35  ;;  %vm305_vm2 = vcmp.eq.s32.totalorder %v263_v50, %v1834_v36 }
  0xab   : > { %v340_v49 = vpop.permute.xlu1 %339 }
  0xac   : > { %vm382_vm12 = vcmp.eq.s32.totalorder %v340_v49, %v1831_v35  ;;  %vm383_vm13 = vcmp.eq.s32.totalorder %v340_v49, %v1834_v36 }
  0xad   : > { %vm414_vm1 = vmor %vm302_vm14, %vm382_vm12  ;;  %v266_v52 = vpop.permute.xlu0 %265  ;;  %vm387_vm12 = vcmp.eq.s32.totalorder %v346_v47, %v1834_v36 }
  0xae   : > { %vm415_vm3 = vmor %vm303_vm15, %vm383_vm13  ;;  %vm306_vm11 = vcmp.eq.s32.totalorder %v266_v52, %v1831_v35  ;;  %vm307_vm13 = vcmp.eq.s32.totalorder %v266_v52, %v1834_v36 }
  0xaf   : > { %v343_v51 = vpop.permute.xlu1 %342  ;;  %vm418_vm14 = vmor %vm306_vm11, %vm386_vm10 }
  0xb0   : > { %vm384_vm5 = vcmp.eq.s32.totalorder %v343_v51, %v1831_v35  ;;  %vm385_vm6 = vcmp.eq.s32.totalorder %v343_v51, %v1834_v36  ;;  %vm419_vm15 = vmor %vm307_vm13, %vm387_vm12 }
  0xb1   : > { %vm416_vm4 = vmor %vm304_vm0, %vm384_vm5  ;;  %v275_v56 = vpop.permute.xlu0 %274 }
  0xb2   : > { %vm417_vm7 = vmor %vm305_vm2, %vm385_vm6  ;;  %vm312_vm13 = vcmp.eq.s32.totalorder %v275_v56, %v1831_v35 }
  0xb3   : > { %vm1258_vm8 = vmpackc.low %vm417_vm7, %vm415_vm3 }
  0xb4   : > { %1259 = vmatprep.mubr.msk.bf16.mxu0 %vm1258_vm8, %v1658_v43  ;;  %v269_v53 = vpop.permute.xlu1 %268  ;;  %vm1260_vm9 = vmpackc.low %vm416_vm4, %vm414_vm1 }
  0xb5   : > { %1261 = vmatmul.mubr.msk.bf16.gmra.mxu0 %vm1260_vm9, %v1658_v43  ;;  %vm308_vm0 = vcmp.eq.s32.totalorder %v269_v53, %v1831_v35  ;;  %vm309_vm1 = vcmp.eq.s32.totalorder %v269_v53, %v1834_v36 }
  0xb6   : > { %v358_v59 = vpop.permute.xlu0 %357 }
  0xb9   : > { %v349_v54 = vpop.permute.xlu1 %348 }
  0xba   : > { %vm388_vm2 = vcmp.eq.s32.totalorder %v349_v54, %v1831_v35  ;;  %vm389_vm3 = vcmp.eq.s32.totalorder %v349_v54, %v1834_v36 }
  0xbb   : > { %vm420_vm5 = vmor %vm308_vm0, %vm388_vm2  ;;  %vm313_vm2 = vcmp.eq.s32.totalorder %v275_v56, %v1834_v36  ;;  %v278_v61 = vpop.permute.xlu0 %277 }
  0xbc   : > { %vm421_vm6 = vmor %vm309_vm1, %vm389_vm3 }
  0xbd   : > { %vm1262_vm4 = vmpackc.low %vm421_vm6, %vm419_vm15 }
  0xbe   : > { %1263 = vmatprep.mubr.msk.bf16.mxu0 %vm1262_vm4, %v1658_v43  ;;  %v272_v55 = vpop.permute.xlu1 %271  ;;  %vm1264_vm7 = vmpackc.low %vm420_vm5, %vm418_vm14  ;;  %vm394_vm4 = vcmp.eq.s32.totalorder %v358_v59, %v1831_v35 }
  0xbf   : > { %1265 = vmatmul.mubr.msk.bf16.gmra.mxu0 %vm1264_vm7, %v1658_v43  ;;  %vm310_vm10 = vcmp.eq.s32.totalorder %v272_v55, %v1831_v35  ;;  %vm311_vm11 = vcmp.eq.s32.totalorder %v272_v55, %v1834_v36  ;;  %vm314_vm7 = vcmp.eq.s32.totalorder %v278_v61, %v1831_v35  ;;  %v287_v0 = vpop.permute.xlu0 %286 }
  0xc3   : > { %v352_v57 = vpop.permute.xlu1 %351  ;;  %v290_v2 = vpop.permute.xlu0 %289 }
  0xc4   : > { %vm390_vm8 = vcmp.eq.s32.totalorder %v352_v57, %v1831_v35  ;;  %vm391_vm9 = vcmp.eq.s32.totalorder %v352_v57, %v1834_v36 }
  0xc5   : > { %vm422_vm12 = vmor %vm310_vm10, %vm390_vm8  ;;  %vm395_vm8 = vcmp.eq.s32.totalorder %v358_v59, %v1834_v36 }
  0xc6   : > { %vm423_vm0 = vmor %vm311_vm11, %vm391_vm9  ;;  %vm315_vm9 = vcmp.eq.s32.totalorder %v278_v61, %v1834_v36 }
  0xc7   : > { %v355_v58 = vpop.permute.xlu1 %354  ;;  %vm426_vm10 = vmor %vm314_vm7, %vm394_vm4 }
  0xc8   : > { %vm392_vm14 = vcmp.eq.s32.totalorder %v355_v58, %v1831_v35  ;;  %vm393_vm15 = vcmp.eq.s32.totalorder %v355_v58, %v1834_v36  ;;  %v370_v6 = vpop.permute.xlu0 %369 }
  0xc9   : > { %vm424_vm3 = vmor %vm312_vm13, %vm392_vm14 }
  0xca   : > { %vm425_vm1 = vmor %vm313_vm2, %vm393_vm15 }
  0xcb   : > { %vm1266_vm5 = vmpackc.low %vm425_vm1, %vm423_vm0 }
  0xcc   : > { %1267 = vmatprep.mubr.msk.bf16.mxu0 %vm1266_vm5, %v1658_v43  ;;  %v281_v60 = vpop.permute.xlu1 %280  ;;  %vm1268_vm6 = vmpackc.low %vm424_vm3, %vm422_vm12 }
  0xcd   : > { %1269 = vmatmul.mubr.msk.bf16.gmra.mxu0 %vm1268_vm6, %v1658_v43  ;;  %vm316_vm11 = vcmp.eq.s32.totalorder %v281_v60, %v1831_v35  ;;  %vm427_vm13 = vmor %vm315_vm9, %vm395_vm8  ;;  %vm317_vm14 = vcmp.eq.s32.totalorder %v281_v60, %v1834_v36  ;;  %vm320_vm9 = vcmp.eq.s32.totalorder %v287_v0, %v1831_v35 }
  0xd1   : > { %v361_v62 = vpop.permute.xlu1 %360 }
  0xd2   : > { %vm396_vm0 = vcmp.eq.s32.totalorder %v361_v62, %v1831_v35  ;;  %vm397_vm12 = vcmp.eq.s32.totalorder %v361_v62, %v1834_v36 }
  0xd3   : > { %vm428_vm15 = vmor %vm316_vm11, %vm396_vm0  ;;  %vm321_vm0 = vcmp.eq.s32.totalorder %v287_v0, %v1834_v36 }
  0xd4   : > { %vm429_vm2 = vmor %vm317_vm14, %vm397_vm12 }
  0xd5   : > { %vm1270_vm3 = vmpackc.low %vm429_vm2, %vm427_vm13 }
  0xd6   : > { %1271 = vmatprep.mubr.msk.bf16.mxu0 %vm1270_vm3, %v1658_v43  ;;  %v284_v63 = vpop.permute.xlu1 %283  ;;  %vm1272_vm1 = vmpackc.low %vm428_vm15, %vm426_vm10  ;;  %vm322_vm3 = vcmp.eq.s32.totalorder %v290_v2, %v1831_v35 }
  0xd7   : > { %1273 = vmatmul.mubr.msk.bf16.gmra.mxu0 %vm1272_vm1, %v1658_v43  ;;  %vm318_vm4 = vcmp.eq.s32.totalorder %v284_v63, %v1831_v35  ;;  %vm319_vm7 = vcmp.eq.s32.totalorder %v284_v63, %v1834_v36  ;;  %vm402_vm1 = vcmp.eq.s32.totalorder %v370_v6, %v1831_v35 }
  0xdb   : > { %v364_v1 = vpop.permute.xlu1 %363 }
  0xdc   : > { %vm398_vm5 = vcmp.eq.s32.totalorder %v364_v1, %v1831_v35  ;;  %vm399_vm6 = vcmp.eq.s32.totalorder %v364_v1, %v1834_v36 }
  0xdd   : > { %vm1906_vm8 = vmor %vm318_vm4, %vm398_vm5  ;;  %vm323_vm5 = vcmp.eq.s32.totalorder %v290_v2, %v1834_v36 }
  0xde   : > { %vm431_vm10 = vmor %vm319_vm7, %vm399_vm6  ;;  %vm403_vm6 = vcmp.eq.s32.totalorder %v370_v6, %v1834_v36 }
  0xdf   : > { %v367_v4 = vpop.permute.xlu1 %366  ;;  %vm1928_vm4 = vmor %vm322_vm3, %vm402_vm1 }
  0xe0   : > { %vm400_vm11 = vcmp.eq.s32.totalorder %v367_v4, %v1831_v35  ;;  %vm401_vm13 = vcmp.eq.s32.totalorder %v367_v4, %v1834_v36  ;;  %vm435_vm7 = vmor %vm323_vm5, %vm403_vm6 }
  0xe1   : > { %vm432_vm12 = vmor %vm320_vm9, %vm400_vm11 }
  0xe2   : > { %vm433_vm14 = vmor %vm321_vm0, %vm401_vm13 }
  0xe3   : > { %vm1274_vm15 = vmpackc.low %vm433_vm14, %vm431_vm10 }
  0xe4   : > { %1275 = vmatprep.mubr.msk.bf16.mxu0 %vm1274_vm15, %v1658_v43  ;;  %v293_v7 = vpop.permute.xlu1 %292  ;;  %vm1276_vm2 = vmpackc.low %vm432_vm12, %vm1906_vm8 }
  0xe5   : > { %1277 = vmatmul.mubr.msk.bf16.gmra.mxu0 %vm1276_vm2, %v1658_v43  ;;  %vm324_vm8 = vcmp.eq.s32.totalorder %v293_v7, %v1831_v35  ;;  %vm325_vm11 = vcmp.eq.s32.totalorder %v293_v7, %v1834_v36 }
  0xe9   : > { %v373_v10 = vpop.permute.xlu1 %372 }
  0xea   : > { %vm404_vm9 = vcmp.eq.s32.totalorder %v373_v10, %v1831_v35  ;;  %vm405_vm10 = vcmp.eq.s32.totalorder %v373_v10, %v1834_v36 }
  0xeb   : > { %vm436_vm13 = vmor %vm324_vm8, %vm404_vm9 }
  0xec   : > { %vm437_vm0 = vmor %vm325_vm11, %vm405_vm10 }
  0xed   : > { %vm1278_vm12 = vmpackc.low %vm437_vm0, %vm435_vm7 }
  0xee   : > { %1279 = vmatprep.mubr.msk.bf16.mxu0 %vm1278_vm12, %v1658_v43  ;;  %vm1280_vm14 = vmpackc.low %vm436_vm13, %vm1928_vm4 }
  0xef   : > { %1281 = vmatmul.mubr.msk.bf16.gmra.mxu0 %vm1280_vm14, %v1658_v43 }
 0x15d   : > { %v1313_v17 = vpop.f32.mrf.mxu0 }
 0x15f   : > { %v1314_v18 = vpop.f32.mrf.mxu0 }
 0x160   : > { %v1315_v20 = vadd.f32 %v1314_v18, %v1313_v17 }
 0x161   : > { %v1316_v21 = vpop.f32.mrf.mxu0 }
 0x162   : > { %v688_v22 = vadd.f32 %v1315_v20, %v1961_v19 }
 0x163   : > { %v1317_v23 = vpop.f32.mrf.mxu0 }
 0x164   : > { %v1318_v24 = vadd.f32 %v1317_v23, %v1316_v21  ;;  %1498 = vtanh.f32 %v688_v22 }
 0x166   : > { %v691_v25 = vadd.f32 %v1318_v24, %v1961_v19 }
 0x168   : > { %1500 = vtanh.f32 %v691_v25  ;;  %v1319_v26 = vpop.f32.mrf.mxu0 }
 0x16a   : > { %v1320_v27 = vpop.f32.mrf.mxu0 }
 0x16b   : > { %v1321_v28 = vadd.f32 %v1320_v27, %v1319_v26 }
 0x16c   : > { %v1322_v29 = vpop.f32.mrf.mxu0 }
 0x16d   : > { %v696_v30 = vadd.f32 %v1321_v28, %v1961_v19 }
 0x16e   : > { %v1323_v31 = vpop.f32.mrf.mxu0 }
 0x16f   : > { %v1324_v32 = vadd.f32 %v1323_v31, %v1322_v29  ;;  %1502 = vtanh.f32 %v696_v30 }
 0x171   : > { %v699_v33 = vadd.f32 %v1324_v32, %v1961_v19  ;;  %v1499_v34 = vpop.eup %1498 }
 0x173   : > { %1504 = vtanh.f32 %v699_v33 }
 0x175   : > { %v1501_v35 = vpop.eup %1500  ;;  %v1325_v36 = vpop.f32.mrf.mxu0 }
 0x176   : > { %v766_v37 = vpack.c.bf16 %v1501_v35, %v1499_v34 }
 0x177   : > { %v1326_v38 = vpop.f32.mrf.mxu0 }
 0x178   : > { %v1327_v39 = vadd.f32 %v1326_v38, %v1325_v36  ;;  %1393 = vmatprep.mubr.bf16.mxu1 %v766_v37 }
 0x179   : > { %v1328_v40 = vpop.f32.mrf.mxu0 }
 0x17a   : > { %v704_v41 = vadd.f32 %v1327_v39, %v1961_v19 }
 0x17b   : > { %v1329_v42 = vpop.f32.mrf.mxu0 }
 0x17c   : > { %v1330_v43 = vadd.f32 %v1329_v42, %v1328_v40  ;;  %v1503_v45 = vpop.eup %1502  ;;  %1506 = vtanh.f32 %v704_v41 }
 0x17e   : > { %v707_v44 = vadd.f32 %v1330_v43, %v1961_v19  ;;  %v1282_v43 = vld [vmem:[%s2154_s4] ss:$0 sm:$0xff] }
 0x17f   : > { %v1331_v46 = vpop.f32.mrf.mxu0 }
 0x180   : > { %v1505_v47 = vpop.eup %1504  ;;  %1508 = vtanh.f32 %v707_v44 }
 0x181   : > { %v1332_v48 = vpop.f32.mrf.mxu0  ;;  %v767_v49 = vpack.c.bf16 %v1505_v47, %v1503_v45 }
 0x182   : > { %v1333_v50 = vadd.f32 %v1332_v48, %v1331_v46 }
 0x183   : > { %1394 = vmatmul.mubr.bf16.vlgmr.msra.gmra.mxu1 %v767_v49  ;;  %v1334_v51 = vpop.f32.mrf.mxu0 }
 0x184   : > { %v712_v52 = vadd.f32 %v1333_v50, %v1961_v19 }
 0x185   : > { %v1335_v53 = vpop.f32.mrf.mxu0 }
 0x186   : > { %v1336_v54 = vadd.f32 %v1335_v53, %v1334_v51  ;;  %1510 = vtanh.f32 %v712_v52 }
 0x188   : > { %v715_v55 = vadd.f32 %v1336_v54, %v1961_v19 }
 0x189   : > { %v1507_v56 = vpop.eup %1506 }
 0x18a   : > { %1512 = vtanh.f32 %v715_v55 }
 0x18d   : > { %v1509_v57 = vpop.eup %1508  ;;  %v1337_v58 = vpop.f32.mrf.mxu0 }
 0x18e   : > { %v768_v59 = vpack.c.bf16 %v1509_v57, %v1507_v56 }
 0x18f   : > { %v1338_v60 = vpop.f32.mrf.mxu0 }
 0x190   : > { %v1339_v61 = vadd.f32 %v1338_v60, %v1337_v58  ;;  %1397 = vmatprep.mubr.bf16.mxu1 %v768_v59 }
 0x191   : > { %v1340_v62 = vpop.f32.mrf.mxu0 }
 0x192   : > { %v720_v63 = vadd.f32 %v1339_v61, %v1961_v19 }
 0x193   : > { %v1341_v0 = vpop.f32.mrf.mxu0  ;;  %v1511_v2 = vpop.eup %1510 }
 0x194   : > { %v1342_v1 = vadd.f32 %v1341_v0, %v1340_v62  ;;  %1514 = vtanh.f32 %v720_v63 }
 0x196   : > { %v723_v3 = vadd.f32 %v1342_v1, %v1961_v19 }
 0x197   : > { %v1513_v4 = vpop.eup %1512  ;;  %v1343_v5 = vpop.f32.mrf.mxu0 }
 0x198   : > { %1516 = vtanh.f32 %v723_v3  ;;  %v769_v6 = vpack.c.bf16 %v1513_v4, %v1511_v2 }
 0x199   : > { %v1344_v7 = vpop.f32.mrf.mxu0 }
 0x19a   : > { %v1345_v8 = vadd.f32 %v1344_v7, %v1343_v5  ;;  %1398 = vmatmul.mubr.bf16.gmra.mxu1 %v769_v6 }
 0x19b   : > { %v1346_v9 = vpop.f32.mrf.mxu0 }
 0x19c   : > { %v728_v10 = vadd.f32 %v1345_v8, %v1961_v19 }
 0x19d   : > { %v1347_v11 = vpop.f32.mrf.mxu0 }
 0x19e   : > { %v1348_v12 = vadd.f32 %v1347_v11, %v1346_v9  ;;  %1518 = vtanh.f32 %v728_v10 }
 0x1a0   : > { %v731_v13 = vadd.f32 %v1348_v12, %v1961_v19 }
 0x1a1   : > { %v1515_v14 = vpop.eup %1514 }
 0x1a2   : > { %1520 = vtanh.f32 %v731_v13 }
 0x1a5   : > { %v1517_v15 = vpop.eup %1516  ;;  %v1349_v16 = vpop.f32.mrf.mxu0 }
 0x1a6   : > { %v770_v17 = vpack.c.bf16 %v1517_v15, %v1515_v14 }
 0x1a7   : > { %v1350_v18 = vpop.f32.mrf.mxu0 }
 0x1a8   : > { %v1351_v20 = vadd.f32 %v1350_v18, %v1349_v16  ;;  %1401 = vmatprep.mubr.bf16.mxu1 %v770_v17 }
 0x1a9   : > { %v1352_v21 = vpop.f32.mrf.mxu0 }
 0x1aa   : > { %v736_v22 = vadd.f32 %v1351_v20, %v1961_v19 }
 0x1ab   : > { %v1353_v23 = vpop.f32.mrf.mxu0  ;;  %v1519_v25 = vpop.eup %1518 }
 0x1ac   : > { %v1354_v24 = vadd.f32 %v1353_v23, %v1352_v21  ;;  %1522 = vtanh.f32 %v736_v22 }
 0x1ae   : > { %v739_v26 = vadd.f32 %v1354_v24, %v1961_v19 }
 0x1af   : > { %v1521_v27 = vpop.eup %1520  ;;  %v1355_v28 = vpop.f32.mrf.mxu0 }
 0x1b0   : > { %1524 = vtanh.f32 %v739_v26  ;;  %v771_v29 = vpack.c.bf16 %v1521_v27, %v1519_v25 }
 0x1b1   : > { %v1356_v30 = vpop.f32.mrf.mxu0 }
 0x1b2   : > { %v1357_v31 = vadd.f32 %v1356_v30, %v1355_v28  ;;  %1402 = vmatmul.mubr.bf16.gmra.mxu1 %v771_v29 }
 0x1b3   : > { %v1358_v32 = vpop.f32.mrf.mxu0 }
 0x1b4   : > { %v744_v33 = vadd.f32 %v1357_v31, %v1961_v19 }
 0x1b5   : > { %v1359_v34 = vpop.f32.mrf.mxu0 }
 0x1b6   : > { %v1360_v35 = vadd.f32 %v1359_v34, %v1358_v32  ;;  %1526 = vtanh.f32 %v744_v33 }
 0x1b8   : > { %v747_v36 = vadd.f32 %v1360_v35, %v1961_v19 }
 0x1b9   : > { %v1523_v37 = vpop.eup %1522 }
 0x1ba   : > { %1528 = vtanh.f32 %v747_v36 }
 0x1bd   : > { %v1525_v38 = vpop.eup %1524 }
 0x1be   : > { %v772_v39 = vpack.c.bf16 %v1525_v38, %v1523_v37 }
 0x1c0   : > { %1405 = vmatprep.mubr.bf16.mxu1 %v772_v39 }
 0x1c3   : > { %v1527_v40 = vpop.eup %1526 }
 0x1c7   : > { %v1529_v41 = vpop.eup %1528 }
 0x1c8   : > { %v773_v42 = vpack.c.bf16 %v1529_v41, %v1527_v40 }
 0x1ca   : > { %1406 = vmatmul.mubr.bf16.gmra.mxu1 %v773_v42 }
 0x243   : > { %v1395_v44 = vpop.f32.mrf.mxu1 }
 0x244   : > { %v888_v45 = vadd.f32 %v1395_v44, %v1282_v43 }
 0x245   : > { %v879_v46 = vpop.f32.mrf.mxu1 }
 0x246   : > { %v880_v47 = vadd.f32 %v1282_v43, %v879_v46  ;;  %946 = vmax.xlane.f32.xlu0 %v888_v45 }
 0x247   : > { %v1396_v19 = vpop.f32.mrf.mxu1 }
 0x248   : > { %942 = vmax.xlane.f32.xlu1 %v880_v47  ;;  %v891_v49 = vadd.f32 %v1396_v19, %v1282_v43 }
 0x249   : > { %v882_v48 = vpop.f32.mrf.mxu1 }
 0x24a   : > { %v883_v50 = vadd.f32 %v1282_v43, %v882_v48 }
 0x24c   : > { %944 = vmax.xlane.f32.xlu0 %v883_v50  ;;  %948 = vmax.xlane.f32.xlu1 %v891_v49 }
 0x25a   : > { %v1399_v51 = vpop.f32.mrf.mxu1 }
 0x25b   : > { %v904_v52 = vadd.f32 %v1399_v51, %v1282_v43 }
 0x25c   : > { %v895_v53 = vpop.f32.mrf.mxu1 }
 0x25d   : > { %954 = vmax.xlane.f32.xlu0 %v904_v52  ;;  %v896_v55 = vadd.f32 %v1282_v43, %v895_v53 }
 0x25e   : > { %v1400_v54 = vpop.f32.mrf.mxu1 }
 0x25f   : > { %v907_v56 = vadd.f32 %v1400_v54, %v1282_v43 }
 0x260   : > { %v898_v57 = vpop.f32.mrf.mxu1 }
 0x261   : > { %956 = vmax.xlane.f32.xlu1 %v907_v56  ;;  %950 = vmax.xlane.f32.xlu0 %v896_v55  ;;  %v899_v58 = vadd.f32 %v1282_v43, %v898_v57 }
 0x265   : > { %952 = vmax.xlane.f32.xlu1 %v899_v58 }
 0x272   : > { %v1403_v59 = vpop.f32.mrf.mxu1 }
 0x273   : > { %v1982_v60 = vadd.f32 %v1403_v59, %v1282_v43 }
 0x274   : > { %v911_v61 = vpop.f32.mrf.mxu1 }
 0x275   : > { %962 = vmax.xlane.f32.xlu0 %v1982_v60  ;;  %v1985_v63 = vadd.f32 %v1282_v43, %v911_v61 }
 0x276   : > { %v1404_v62 = vpop.f32.mrf.mxu1 }
 0x277   : > { %v1987_v0 = vadd.f32 %v1404_v62, %v1282_v43 }
 0x278   : > { %v914_v1 = vpop.f32.mrf.mxu1 }
 0x279   : > { %964 = vmax.xlane.f32.xlu1 %v1987_v0  ;;  %958 = vmax.xlane.f32.xlu0 %v1985_v63  ;;  %v1991_v2 = vadd.f32 %v1282_v43, %v914_v1 }
 0x27d   : > { %960 = vmax.xlane.f32.xlu1 %v1991_v2 }
 0x28a   : > { %v1407_v3 = vpop.f32.mrf.mxu1 }
 0x28b   : > { %v1997_v8 = vadd.f32 %v1407_v3, %v1282_v43 }
 0x28c   : > { %v927_v4 = vpop.f32.mrf.mxu1 }
 0x28d   : > { %v1994_v5 = vadd.f32 %v1282_v43, %v927_v4 }
 0x28e   : > { %v1408_v6 = vpop.f32.mrf.mxu1 }
 0x28f   : > { %966 = vmax.xlane.f32.xlu0 %v1994_v5  ;;  %v2003_v10 = vadd.f32 %v1408_v6, %v1282_v43 }
 0x290   : > { %v930_v7 = vpop.f32.mrf.mxu1 }
 0x291   : > { %v1999_v9 = vadd.f32 %v1282_v43, %v930_v7 }
 0x293   : > { %968 = vmax.xlane.f32.xlu1 %v1999_v9  ;;  %970 = vmax.xlane.f32.xlu0 %v1997_v8 }
 0x297   : > { %972 = vmax.xlane.f32.xlu1 %v2003_v10 }
 0x2cf   : > { %v947_v11 = vpop.xlane.xlu0 %946 }
 0x2d0   : > { %v2006_v12 = vsub.f32 %v888_v45, %v947_v11 }
 0x2d1   : > { %v943_v13 = vpop.xlane.xlu1 %942 }
 0x2d2   : > { %v994_v14 = vmul.f32 1.442695, %v2006_v12  ;;  %v2009_v15 = vsub.f32 %v880_v47, %v943_v13 }
 0x2d4   : > { %1530 = vpow2.f32 %v994_v14  ;;  %v990_v16 = vmul.f32 1.442695, %v2009_v15 }
 0x2d5   : > { %v949_v17 = vpop.xlane.xlu1 %948  ;;  %v945_v18 = vpop.xlane.xlu0 %944 }
 0x2d6   : > { %v2012_v20 = vsub.f32 %v891_v49, %v949_v17  ;;  %v2014_v21 = vsub.f32 %v883_v50, %v945_v18  ;;  %1532 = vpow2.f32 %v990_v16 }
 0x2d8   : > { %v996_v22 = vmul.f32 1.442695, %v2012_v20  ;;  %v992_v23 = vmul.f32 1.442695, %v2014_v21 }
 0x2da   : > { %1534 = vpow2.f32 %v996_v22 }
 0x2db   : > { %1536 = vpow2.f32 %v992_v23 }
 0x2e1   : > { %v1531_v24 = vpop.eup %1530 }
 0x2e2   : > { %1026 = vadd.xlane.f32.xlu0 %v1531_v24 }
 0x2e3   : > { %v1533_v25 = vpop.eup %1532 }
 0x2e6   : > { %1022 = vadd.xlane.f32.xlu0 %v1533_v25  ;;  %v955_v26 = vpop.xlane.xlu0 %954 }
 0x2e7   : > { %v1535_v27 = vpop.eup %1534  ;;  %v2018_v28 = vsub.f32 %v904_v52, %v955_v26 }
 0x2e8   : > { %1028 = vadd.xlane.f32.xlu1 %v1535_v27  ;;  %v1537_v32 = vpop.eup %1536 }
 0x2e9   : > { %v1002_v29 = vmul.f32 1.442695, %v2018_v28 }
 0x2ea   : > { %v957_v30 = vpop.xlane.xlu1 %956  ;;  %v951_v31 = vpop.xlane.xlu0 %950 }
 0x2eb   : > { %1538 = vpow2.f32 %v1002_v29  ;;  %v2021_v33 = vsub.f32 %v907_v56, %v957_v30  ;;  %v2023_v34 = vsub.f32 %v896_v55, %v951_v31 }
 0x2ec   : > { %1024 = vadd.xlane.f32.xlu1 %v1537_v32 }
 0x2ed   : > { %v1004_v35 = vmul.f32 1.442695, %v2021_v33  ;;  %v998_v36 = vmul.f32 1.442695, %v2023_v34 }
 0x2ee   : > { %v953_v37 = vpop.xlane.xlu1 %952 }
 0x2ef   : > { %1540 = vpow2.f32 %v1004_v35  ;;  %v2027_v38 = vsub.f32 %v899_v58, %v953_v37 }
 0x2f0   : > { %1542 = vpow2.f32 %v998_v36 }
 0x2f1   : > { %v1000_v39 = vmul.f32 1.442695, %v2027_v38 }
 0x2f3   : > { %1544 = vpow2.f32 %v1000_v39 }
 0x2f8   : > { %v1539_v40 = vpop.eup %1538 }
 0x2f9   : > { %1034 = vadd.xlane.f32.xlu0 %v1539_v40 }
 0x2fc   : > { %v1541_v41 = vpop.eup %1540 }
 0x2fd   : > { %v1543_v42 = vpop.eup %1542  ;;  %1036 = vadd.xlane.f32.xlu1 %v1541_v41 }
 0x2fe   : > { %1030 = vadd.xlane.f32.xlu0 %v1543_v42  ;;  %v963_v43 = vpop.xlane.xlu0 %962 }
 0x2ff   : > { %v2031_v44 = vsub.f32 %v1982_v60, %v963_v43 }
 0x300   : > { %v1545_v45 = vpop.eup %1544 }
 0x301   : > { %v1010_v46 = vmul.f32 1.442695, %v2031_v44  ;;  %1032 = vadd.xlane.f32.xlu1 %v1545_v45 }
 0x302   : > { %v965_v47 = vpop.xlane.xlu1 %964  ;;  %v959_v19 = vpop.xlane.xlu0 %958 }
 0x303   : > { %1546 = vpow2.f32 %v1010_v46  ;;  %v2035_v48 = vsub.f32 %v1987_v0, %v965_v47  ;;  %v2038_v49 = vsub.f32 %v1985_v63, %v959_v19 }
 0x305   : > { %v1012_v50 = vmul.f32 1.442695, %v2035_v48  ;;  %v1006_v51 = vmul.f32 1.442695, %v2038_v49 }
 0x306   : > { %v961_v52 = vpop.xlane.xlu1 %960 }
 0x307   : > { %1548 = vpow2.f32 %v1012_v50  ;;  %v2043_v53 = vsub.f32 %v1991_v2, %v961_v52 }
 0x308   : > { %1550 = vpow2.f32 %v1006_v51 }
 0x309   : > { %v1008_v54 = vmul.f32 1.442695, %v2043_v53 }
 0x30b   : > { %1552 = vpow2.f32 %v1008_v54 }
 0x310   : > { %v1547_v55 = vpop.eup %1546 }
 0x311   : > { %1042 = vadd.xlane.f32.xlu0 %v1547_v55 }
 0x314   : > { %v1549_v56 = vpop.eup %1548 }
 0x315   : > { %v1551_v57 = vpop.eup %1550  ;;  %1044 = vadd.xlane.f32.xlu1 %v1549_v56 }
 0x316   : > { %1038 = vadd.xlane.f32.xlu0 %v1551_v57 }
 0x318   : > { %v1553_v58 = vpop.eup %1552  ;;  %v967_v59 = vpop.xlane.xlu0 %966 }
 0x319   : > { %v2047_v60 = vsub.f32 %v1994_v5, %v967_v59  ;;  %1040 = vadd.xlane.f32.xlu1 %v1553_v58 }
 0x31b   : > { %v1014_v61 = vmul.f32 1.442695, %v2047_v60 }
 0x31c   : > { %v969_v62 = vpop.xlane.xlu1 %968  ;;  %v971_v63 = vpop.xlane.xlu0 %970 }
 0x31d   : > { %1554 = vpow2.f32 %v1014_v61  ;;  %v2051_v0 = vsub.f32 %v1999_v9, %v969_v62  ;;  %v2054_v1 = vsub.f32 %v1997_v8, %v971_v63 }
 0x31f   : > { %v1016_v2 = vmul.f32 1.442695, %v2051_v0  ;;  %v1018_v3 = vmul.f32 1.442695, %v2054_v1 }
 0x320   : > { %v973_v4 = vpop.xlane.xlu1 %972 }
 0x321   : > { %1556 = vpow2.f32 %v1016_v2  ;;  %v2059_v5 = vsub.f32 %v2003_v10, %v973_v4 }
 0x322   : > { %1558 = vpow2.f32 %v1018_v3 }
 0x323   : > { %v1020_v6 = vmul.f32 1.442695, %v2059_v5 }
 0x325   : > { %1560 = vpow2.f32 %v1020_v6 }
 0x32a   : > { %v1555_v7 = vpop.eup %1554 }
 0x32b   : > { %1046 = vadd.xlane.f32.xlu0 %v1555_v7 }
 0x32e   : > { %v1557_v9 = vpop.eup %1556 }
 0x32f   : > { %v1559_v8 = vpop.eup %1558  ;;  %1048 = vadd.xlane.f32.xlu1 %v1557_v9 }
 0x330   : > { %1050 = vadd.xlane.f32.xlu0 %v1559_v8 }
 0x332   : > { %v1561_v11 = vpop.eup %1560 }
 0x333   : > { %1052 = vadd.xlane.f32.xlu1 %v1561_v11 }
 0x36b   : > { %v1027_v13 = vpop.xlane.xlu0 %1026 }
 0x36c   : > { %1562 = vlog2.f32 %v1027_v13 }
 0x36f   : > { %v1023_v14 = vpop.xlane.xlu0 %1022 }
 0x370   : > { %1564 = vlog2.f32 %v1023_v14 }
 0x371   : > { %v1029_v10 = vpop.xlane.xlu1 %1028 }
 0x372   : > { %1566 = vlog2.f32 %v1029_v10 }
 0x375   : > { %v1025_v16 = vpop.xlane.xlu1 %1024 }
 0x376   : > { %1568 = vlog2.f32 %v1025_v16 }
 0x379   : > { %v1563_v17 = vpop.eup %1562 }
 0x37a   : > { %v1059_v18 = vmul.f32 0.6931472, %v1563_v17 }
 0x37c   : > { %v1088_v22 = vsub.f32 %v2006_v12, %v1059_v18 }
 0x37d   : > { %v1565_v23 = vpop.eup %1564 }
 0x37e   : > { %1104 = vst [vmem:[%s2066_s16 + $0x10] sm:$0xff] %v1088_v22  ;;  %v1055_v24 = vmul.f32 0.6931472, %v1565_v23 }
 0x37f   : > { %v1567_v25 = vpop.eup %1566 }
 0x380   : > { %v1086_v26 = vsub.f32 %v2009_v15, %v1055_v24  ;;  %v1061_v27 = vmul.f32 0.6931472, %v1567_v25 }
 0x382   : > { %1102 = vst [vmem:[%s2066_s16] sm:$0xff] %v1086_v26  ;;  %v1089_v29 = vsub.f32 %v2012_v20, %v1061_v27  ;;  %v1035_v30 = vpop.xlane.xlu0 %1034 }
 0x383   : > { %v1569_v31 = vpop.eup %1568  ;;  %1570 = vlog2.f32 %v1035_v30 }
 0x384   : > { %1105 = vst [vmem:[%s2066_s16 + $0x18] sm:$0xff] %v1089_v29  ;;  %v1057_v12 = vmul.f32 0.6931472, %v1569_v31 }
 0x386   : > { %v1087_v32 = vsub.f32 %v2014_v21, %v1057_v12  ;;  %v1037_v35 = vpop.xlane.xlu1 %1036 }
 0x387   : > { %1572 = vlog2.f32 %v1037_v35  ;;  %v1031_v36 = vpop.xlane.xlu0 %1030 }
 0x388   : > { %1103 = vst [vmem:[%s2066_s16 + $0x8] sm:$0xff] %v1087_v32  ;;  %1574 = vlog2.f32 %v1031_v36 }
 0x38a   : > { %v1033_v15 = vpop.xlane.xlu1 %1032 }
 0x38b   : > { %1576 = vlog2.f32 %v1033_v15 }
 0x390   : > { %v1571_v37 = vpop.eup %1570 }
 0x391   : > { %v1067_v39 = vmul.f32 0.6931472, %v1571_v37 }
 0x393   : > { %v1092_v20 = vsub.f32 %v2018_v28, %v1067_v39 }
 0x394   : > { %v1573_v40 = vpop.eup %1572 }
 0x395   : > { %v1575_v41 = vpop.eup %1574  ;;  %1108 = vst [vmem:[%s2066_s16 + $0x30] sm:$0xff] %v1092_v20  ;;  %v1069_v42 = vmul.f32 0.6931472, %v1573_v40 }
 0x396   : > { %v1063_v43 = vmul.f32 0.6931472, %v1575_v41 }
 0x397   : > { %v1093_v21 = vsub.f32 %v2021_v33, %v1069_v42 }
 0x398   : > { %v1577_v45 = vpop.eup %1576  ;;  %v1090_v46 = vsub.f32 %v2023_v34, %v1063_v43 }
 0x399   : > { %1109 = vst [vmem:[%s2066_s16 + $0x38] sm:$0xff] %v1093_v21  ;;  %v1065_v47 = vmul.f32 0.6931472, %v1577_v45 }
 0x39a   : > { %1106 = vst [vmem:[%s2066_s16 + $0x20] sm:$0xff] %v1090_v46  ;;  %v1043_v19 = vpop.xlane.xlu0 %1042 }
 0x39b   : > { %v1091_v50 = vsub.f32 %v2027_v38, %v1065_v47  ;;  %1578 = vlog2.f32 %v1043_v19 }
 0x39d   : > { %1107 = vst [vmem:[%s2066_s16 + $0x28] sm:$0xff] %v1091_v50 }
 0x39e   : > { %v1045_v28 = vpop.xlane.xlu1 %1044 }
 0x39f   : > { %1580 = vlog2.f32 %v1045_v28  ;;  %v1039_v51 = vpop.xlane.xlu0 %1038 }
 0x3a0   : > { %1582 = vlog2.f32 %v1039_v51 }
 0x3a2   : > { %v1041_v52 = vpop.xlane.xlu1 %1040 }
 0x3a3   : > { %1584 = vlog2.f32 %v1041_v52 }
 0x3a8   : > { %v1579_v33 = vpop.eup %1578 }
 0x3a9   : > { %v1075_v34 = vmul.f32 0.6931472, %v1579_v33 }
 0x3ab   : > { %v1096_v54 = vsub.f32 %v2031_v44, %v1075_v34 }
 0x3ac   : > { %v1581_v55 = vpop.eup %1580 }
 0x3ad   : > { %v1583_v56 = vpop.eup %1582  ;;  %1112 = vst [vmem:[%s2066_s16 + $0x50] sm:$0xff] %v1096_v54  ;;  %v1077_v57 = vmul.f32 0.6931472, %v1581_v55 }
 0x3ae   : > { %v1071_v38 = vmul.f32 0.6931472, %v1583_v56 }
 0x3af   : > { %v1097_v58 = vsub.f32 %v2035_v48, %v1077_v57 }
 0x3b0   : > { %v1585_v59 = vpop.eup %1584  ;;  %v1094_v61 = vsub.f32 %v2038_v49, %v1071_v38 }
 0x3b1   : > { %1113 = vst [vmem:[%s2066_s16 + $0x58] sm:$0xff] %v1097_v58  ;;  %v1073_v62 = vmul.f32 0.6931472, %v1585_v59 }
 0x3b2   : > { %1110 = vst [vmem:[%s2066_s16 + $0x40] sm:$0xff] %v1094_v61 }
 0x3b3   : > { %v1095_v63 = vsub.f32 %v2043_v53, %v1073_v62 }
 0x3b4   : > { %v1047_v2 = vpop.xlane.xlu0 %1046 }
 0x3b5   : > { %1111 = vst [vmem:[%s2066_s16 + $0x48] sm:$0xff] %v1095_v63  ;;  %1586 = vlog2.f32 %v1047_v2 }
 0x3b8   : > { %v1049_v44 = vpop.xlane.xlu1 %1048 }
 0x3b9   : > { %1588 = vlog2.f32 %v1049_v44  ;;  %v1051_v3 = vpop.xlane.xlu0 %1050 }
 0x3ba   : > { %1590 = vlog2.f32 %v1051_v3 }
 0x3bc   : > { %v1053_v48 = vpop.xlane.xlu1 %1052 }
 0x3bd   : > { %1592 = vlog2.f32 %v1053_v48 }
 0x3c2   : > { %v1587_v49 = vpop.eup %1586 }
 0x3c3   : > { %v1079_v4 = vmul.f32 0.6931472, %v1587_v49 }
 0x3c5   : > { %v1098_v6 = vsub.f32 %v2047_v60, %v1079_v4 }
 0x3c6   : > { %v1589_v7 = vpop.eup %1588 }
 0x3c7   : > { %v1591_v53 = vpop.eup %1590  ;;  %1114 = vst [vmem:[%s2066_s16 + $0x60] sm:$0xff] %v1098_v6  ;;  %v1081_v9 = vmul.f32 0.6931472, %v1589_v7 }
 0x3c8   : > { %v1083_v8 = vmul.f32 0.6931472, %v1591_v53 }
 0x3c9   : > { %v1099_v11 = vsub.f32 %v2051_v0, %v1081_v9 }
 0x3ca   : > { %v1593_v13 = vpop.eup %1592  ;;  %v1100_v14 = vsub.f32 %v2054_v1, %v1083_v8 }
 0x3cb   : > { %1115 = vst [vmem:[%s2066_s16 + $0x68] sm:$0xff] %v1099_v11  ;;  %v1085_v10 = vmul.f32 0.6931472, %v1593_v13 }
 0x3cc   : > { %1116 = vst [vmem:[%s2066_s16 + $0x70] sm:$0xff] %v1100_v14 }
 0x3cd   : > { %v1101_v60 = vsub.f32 %v2059_v5, %v1085_v10 }
 0x3cf   : > { %1117 = vst [vmem:[%s2066_s16 + $0x78] sm:$0xff] %v1101_v60 }
 0x3d0   : > { %1607 = shalt.err (!%p1604_p3)
}
 0x3d1   : > { %s1608_s25 = scalar_lea.hbm %s2102_s30, 2048  ;;  %s1612_s13 = scalar_lea.hbm %s2155_s5, 4096 }
 0x3d2   : > { %p1609_p4 = scmp.ne.s32.totalorder %s2102_s30, %s1608_s25  ;;  %p1613_p9 = scmp.lt.s32.totalorder %s2102_s30, %s2155_s5 }
 0x3d3   : > { %p1614_p10 = scmp.lt.s32.totalorder %s1612_s13, %s1608_s25 }
 0x3d4   : > { %p1610_p7 = pnand %p1609_p4, %p1730_p5 }
 0x3d5   : > { %p1615_p11 = por %p1614_p10, %p1613_p9 }
 0x3d6   : > { %p1611_p8 = pneg %p1610_p7 }
 0x3d8   : > { %p1616_p12 = pnand %p1615_p11, %p1611_p8 }
 0x3da   : > { %1619 = shalt.err (!%p1616_p12)
}
 0x3db   : > { %s1660_s16 = smov 128   ;;  %s1661_s17 = smov 8  }
 0x3dc   : > { %1409 = dma.vmem_to_hbm [thread:$0]  (%p1730_p5), %s2104_s23, 2048, %s2102_s30, %s2110_s22, %s1660_s16, %s1660_s16, %s1661_s17  }
 0x3dd PF: > { %p1415_p13 = scmp.ge.s32.totalorder %s1654_s21, 2  ;;  %s1147_s26 = sand.u32 1, %s1642_s18  }
 0x3de   : > { %s1148_s6 = scalar_lea.sflag [#allocation3], %s1147_s26 }
 0x3df   : > { %p1412_p0 = pnand %p1415_p13, %p1734_p6 }
 0x3e1   : > { %p1413_p1 = pneg %p1412_p0 }
 0x3e3   : > { %1637 = dma.done.wait (%p1413_p1), %s1148_s6, 2048  }
 0x3e4   : > { %1639 = vsyncadd (%p1413_p1), %s1148_s6, 4294965248  ;;  %p15_p2 = scmp.ge.s32.totalorder %s1717_s24, 4   ;;  %s2164_s18 = smov %s1646_s19 }
 0x3e5   : > { %s2165_s19 = smov %s1650_s20  ;;  %s2166_s20 = smov %s1728_s27 }
 0x3e6   : > { %s2167_s21 = smov %s1717_s24  ;;  %17 = sbr.rel (!%p15_p2) target bundleno = 3 (0x3), region = 75 }
 0x3eb   :  { %1153 = vsyncpa [#allocation3], 1 }
 0x3ec   :  { %1155 = vsyncpa [#allocation3 + $0x1], 1 }

</bundles_post_ra>
